<compile_context>
chip_gen: v5e
topology: v5e:2x2
jax: 0.10.0
libtpu: 0.0.40
codegen_flags: <defaults>
</compile_context>

<pallas_src>
import functools

import numpy as np
import jax
import jax.numpy as jnp
from jax.experimental import pallas as pl
from jax.experimental.pallas import tpu as pltpu


def _nearest_src_indices(out_size, in_size):
    # PyTorch F.interpolate(mode='nearest'): src = floor(dst * in_size / out_size)
    return [min((o * in_size) // out_size, in_size - 1) for o in range(out_size)]


def _pick_block_nc(nc, in_elems, out_elems, itemsize, budget_bytes=8 * 1024 * 1024):
    # Largest divisor of NC whose double-buffered in+out tiles fit the budget.
    per_row = 2 * itemsize * (in_elems + out_elems)
    best = 1
    for d in range(1, nc + 1):
        if nc % d == 0 and d * per_row <= budget_bytes:
            best = d
    return best


def _nearest3d_kernel(dsrc_ref, x_ref, sw_ref, o_ref, *, h_reps):
    # dsrc_ref: (D_out,) int32 in SMEM (scalar-prefetch; used only by the index_maps)
    # x_ref   : (BNC, H_in, W_in)   one source depth-slice (D squeezed by BlockSpec)
    # sw_ref  : (W_in, W_out)       0/1 selection matrix -> exact W-gather on the MXU
    # o_ref   : (BNC, H_out, W_out) one output depth-slice, native NC(D)HW layout
    del dsrc_ref
    bnc, h_in, w_in = x_ref.shape
    w_out = sw_ref.shape[1]

    # W upsampling: single lane-dense matmul (K = W_in, lanes = W_out).
    x2 = x_ref[...].reshape(bnc * h_in, w_in)
    yw = jnp.dot(x2, sw_ref[...], preferred_element_type=jnp.float32)
    yw = yw.reshape(bnc, h_in, w_out)

    # H upsampling: each input row is repeated h_reps[h] times (static, contiguous
    # because the nearest map is monotone) -> broadcast + concat along sublanes.
    pieces = []
    for h, reps in enumerate(h_reps):
        if reps:
            pieces.append(jnp.broadcast_to(yw[:, h:h + 1, :], (bnc, reps, w_out)))
    z = pieces[0] if len(pieces) == 1 else jnp.concatenate(pieces, axis=1)

    o_ref[...] = z.astype(o_ref.dtype)


def interpolate_upsampling(x, size, mode="nearest"):
    """Pallas equivalent of InterpolateUpsampling.forward(x, size).

    x: (N, C, D, H, W); size: (D_out, H_out, W_out).
    """
    if mode != "nearest":
        # TODO(synk): trilinear / area modes not implemented (unet3d default is 'nearest').
        raise NotImplementedError(f"mode={mode!r} not supported; only 'nearest'")

    N, C, D_in, H_in, W_in = x.shape
    D_out, H_out, W_out = size
    NC = N * C

    # Static (Python-side) nearest-neighbor index maps.
    d_src = jnp.asarray(np.array(_nearest_src_indices(D_out, D_in), np.int32))
    h_src = _nearest_src_indices(H_out, H_in)
    h_reps = tuple(h_src.count(h) for h in range(H_in))
    w_src = _nearest_src_indices(W_out, W_in)
    sw = np.zeros((W_in, W_out), np.float32)
    sw[w_src, np.arange(W_out)] = 1.0
    sw = jnp.asarray(sw, dtype=x.dtype)

    x_nc = x.reshape(NC, D_in, H_in, W_in)  # free reshape, layout unchanged (NCDHW)

    block_nc = _pick_block_nc(NC, H_in * W_in, H_out * W_out, x.dtype.itemsize)
    grid = (NC // block_nc, D_out)

    kernel = functools.partial(_nearest3d_kernel, h_reps=h_reps)

    out = pl.pallas_call(
        kernel,
        out_shape=jax.ShapeDtypeStruct((NC, D_out, H_out, W_out), x.dtype),
        grid_spec=pltpu.PrefetchScalarGridSpec(
            num_scalar_prefetch=1,
            grid=grid,
            in_specs=[
                # Depth gather happens here: the D block index is the prefetched source index.
                pl.BlockSpec((block_nc, None, H_in, W_in),
                             lambda i, j, dsrc: (i, dsrc[j], 0, 0)),
                # Tiny constant selection matrix.
                pl.BlockSpec((W_in, W_out), lambda i, j, dsrc: (0, 0)),
            ],
            out_specs=pl.BlockSpec((block_nc, None, H_out, W_out),
                                   lambda i, j, dsrc: (i, j, 0, 0)),
        ),
        compiler_params=pltpu.CompilerParams(
            dimension_semantics=("parallel", "parallel")),
    )(d_src, x_nc, sw)

    return out.reshape(N, C, D_out, H_out, W_out)


def _reference_nearest(x, size):
    D_out, H_out, W_out = size
    _, _, D_in, H_in, W_in = x.shape
    d_idx = jnp.asarray(_nearest_src_indices(D_out, D_in))
    h_idx = jnp.asarray(_nearest_src_indices(H_out, H_in))
    w_idx = jnp.asarray(_nearest_src_indices(W_out, W_in))
    return x[:, :, d_idx][:, :, :, h_idx][:, :, :, :, w_idx]


if __name__ == "__main__":
    N, C, D, H, W = 2, 4, 8, 8, 8
    x = jax.random.normal(jax.random.PRNGKey(0), (N, C, D, H, W), dtype=jnp.float32)

    # Typical UNet decoder use: 2x nearest upsampling.
    size = (16, 16, 16)
    out = interpolate_upsampling(x, size, mode="nearest")
    jax.block_until_ready(out)
    ref = _reference_nearest(x, size)
    assert out.shape == (N, C) + size
    assert jnp.allclose(out, ref, atol=1e-6, rtol=0.0)

    # Non-integer scale factors (general `size` argument) also supported.
    size2 = (12, 20, 24)
    out2 = interpolate_upsampling(x, size2, mode="nearest")
    jax.block_until_ready(out2)
    ref2 = _reference_nearest(x, size2)
    assert out2.shape == (N, C) + size2
    assert jnp.allclose(out2, ref2, atol=1e-6, rtol=0.0)

    print("KERNEL_OK")
</pallas_src>

<mosaic_0001>
module attributes {stable_mosaic.version = 11 : i64} {
  func.func @_nearest3d_kernel(%arg0: i32, %arg1: i32, %arg2: memref<16xi32, #tpu.memory_space<smem>>, %arg3: memref<8x1x8x8xf32, #tpu.memory_space<vmem>>, %arg4: memref<8x16xf32, #tpu.memory_space<vmem>>, %arg5: memref<8x1x16x16xf32, #tpu.memory_space<vmem>>) attributes {dimension_semantics = [#tpu.dimension_semantics<parallel>, #tpu.dimension_semantics<parallel>], iteration_bounds = array<i64: 1, 16>, scalar_prefetch = 1 : i64, scratch_operands = 0 : i64, tpu.core_type = #tpu.core_type<tc>, window_params = [{transform_indices = @transform_0, window_bounds = array<i64: 8, 1, 8, 8>}, {pipeline_mode = #tpu.pipeline_mode<synchronous>, transform_indices = @transform_1, window_bounds = array<i64: 8, 16>}, {transform_indices = @transform_2, window_bounds = array<i64: 8, 1, 16, 16>}]} {
    %c0 = arith.constant 0 : index
    %c0_0 = arith.constant 0 : index
    %c0_1 = arith.constant 0 : index
    %c0_2 = arith.constant 0 : index
    %0 = vector.load %arg3[%c0, %c0_0, %c0_1, %c0_2] : memref<8x1x8x8xf32, #tpu.memory_space<vmem>>, vector<8x1x8x8xf32>
    %1 = vector.shape_cast %0 : vector<8x1x8x8xf32> to vector<8x8x8xf32>
    %2 = vector.shape_cast %1 : vector<8x8x8xf32> to vector<64x8xf32>
    %c0_3 = arith.constant 0 : index
    %c0_4 = arith.constant 0 : index
    %3 = vector.load %arg4[%c0_3, %c0_4] : memref<8x16xf32, #tpu.memory_space<vmem>>, vector<8x16xf32>
    %cst = arith.constant dense<0.000000e+00> : vector<64x16xf32>
    %4 = tpu.matmul %2, %3, %cst {dimension_numbers = #tpu.dot_dimension_numbers<[1], [0], [0], [1], [0, 0, 1, 1], [], []>} : vector<64x8xf32>, vector<8x16xf32>, vector<64x16xf32> -> vector<64x16xf32>
    %5 = vector.shape_cast %4 : vector<64x16xf32> to vector<8x8x16xf32>
    %6 = vector.extract_strided_slice %5 {offsets = [0, 0, 0], sizes = [8, 1, 16], strides = [1, 1, 1]} : vector<8x8x16xf32> to vector<8x1x16xf32>
    %7 = vector.shape_cast %6 : vector<8x1x16xf32> to vector<8x1x16xf32>
    %8 = vector.broadcast %7 : vector<8x1x16xf32> to vector<8x2x16xf32>
    %9 = vector.extract_strided_slice %5 {offsets = [0, 1, 0], sizes = [8, 1, 16], strides = [1, 1, 1]} : vector<8x8x16xf32> to vector<8x1x16xf32>
    %10 = vector.shape_cast %9 : vector<8x1x16xf32> to vector<8x1x16xf32>
    %11 = vector.broadcast %10 : vector<8x1x16xf32> to vector<8x2x16xf32>
    %12 = vector.extract_strided_slice %5 {offsets = [0, 2, 0], sizes = [8, 1, 16], strides = [1, 1, 1]} : vector<8x8x16xf32> to vector<8x1x16xf32>
    %13 = vector.shape_cast %12 : vector<8x1x16xf32> to vector<8x1x16xf32>
    %14 = vector.broadcast %13 : vector<8x1x16xf32> to vector<8x2x16xf32>
    %15 = vector.extract_strided_slice %5 {offsets = [0, 3, 0], sizes = [8, 1, 16], strides = [1, 1, 1]} : vector<8x8x16xf32> to vector<8x1x16xf32>
    %16 = vector.shape_cast %15 : vector<8x1x16xf32> to vector<8x1x16xf32>
    %17 = vector.broadcast %16 : vector<8x1x16xf32> to vector<8x2x16xf32>
    %18 = vector.extract_strided_slice %5 {offsets = [0, 4, 0], sizes = [8, 1, 16], strides = [1, 1, 1]} : vector<8x8x16xf32> to vector<8x1x16xf32>
    %19 = vector.shape_cast %18 : vector<8x1x16xf32> to vector<8x1x16xf32>
    %20 = vector.broadcast %19 : vector<8x1x16xf32> to vector<8x2x16xf32>
    %21 = vector.extract_strided_slice %5 {offsets = [0, 5, 0], sizes = [8, 1, 16], strides = [1, 1, 1]} : vector<8x8x16xf32> to vector<8x1x16xf32>
    %22 = vector.shape_cast %21 : vector<8x1x16xf32> to vector<8x1x16xf32>
    %23 = vector.broadcast %22 : vector<8x1x16xf32> to vector<8x2x16xf32>
    %24 = vector.extract_strided_slice %5 {offsets = [0, 6, 0], sizes = [8, 1, 16], strides = [1, 1, 1]} : vector<8x8x16xf32> to vector<8x1x16xf32>
    %25 = vector.shape_cast %24 : vector<8x1x16xf32> to vector<8x1x16xf32>
    %26 = vector.broadcast %25 : vector<8x1x16xf32> to vector<8x2x16xf32>
    %27 = vector.extract_strided_slice %5 {offsets = [0, 7, 0], sizes = [8, 1, 16], strides = [1, 1, 1]} : vector<8x8x16xf32> to vector<8x1x16xf32>
    %28 = vector.shape_cast %27 : vector<8x1x16xf32> to vector<8x1x16xf32>
    %29 = vector.broadcast %28 : vector<8x1x16xf32> to vector<8x2x16xf32>
    %30 = tpu.concatenate %8, %11, %14, %17, %20, %23, %26, %29 in 1 : vector<8x2x16xf32>, vector<8x2x16xf32>, vector<8x2x16xf32>, vector<8x2x16xf32>, vector<8x2x16xf32>, vector<8x2x16xf32>, vector<8x2x16xf32>, vector<8x2x16xf32> -> vector<8x16x16xf32>
    %c0_5 = arith.constant 0 : index
    %c0_6 = arith.constant 0 : index
    %c0_7 = arith.constant 0 : index
    %c0_8 = arith.constant 0 : index
    %31 = vector.load %arg5[%c0_5, %c0_6, %c0_7, %c0_8] : memref<8x1x16x16xf32, #tpu.memory_space<vmem>>, vector<8x1x16x16xf32>
    %32 = vector.shape_cast %31 : vector<8x1x16x16xf32> to vector<8x16x16xf32>
    %33 = vector.shape_cast %30 : vector<8x16x16xf32> to vector<8x1x16x16xf32>
    tpu.vector_store %arg5[%c0_5, %c0_6, %c0_7, %c0_8], %33 {strides = array<i32>} : memref<8x1x16x16xf32, #tpu.memory_space<vmem>>, vector<8x1x16x16xf32>,
    return
  }
  func.func @transform_0(%arg0: i32, %arg1: i32, %arg2: memref<16xi32, #tpu.memory_space<smem>>) -> (i32, i32, i32, i32) {
    %0 = arith.index_cast %arg1 : i32 to index
    %1 = memref.load %arg2[%0] : memref<16xi32, #tpu.memory_space<smem>>
    %c0_i32 = arith.constant 0 : i32
    %c0_i32_0 = arith.constant 0 : i32
    %c0_i32_1 = arith.constant 0 : i32
    return %arg0, %1, %c0_i32, %c0_i32_0 : i32, i32, i32, i32
  }
  func.func @transform_1(%arg0: i32, %arg1: i32, %arg2: memref<16xi32, #tpu.memory_space<smem>>) -> (i32, i32) {
    %c0_i32 = arith.constant 0 : i32
    %c0_i32_0 = arith.constant 0 : i32
    %c0_i32_1 = arith.constant 0 : i32
    return %c0_i32, %c0_i32_0 : i32, i32
  }
  func.func @transform_2(%arg0: i32, %arg1: i32, %arg2: memref<16xi32, #tpu.memory_space<smem>>) -> (i32, i32, i32, i32) {
    %c0_i32 = arith.constant 0 : i32
    %c0_i32_0 = arith.constant 0 : i32
    %c0_i32_1 = arith.constant 0 : i32
    return %arg0, %arg1, %c0_i32, %c0_i32_0 : i32, i32, i32, i32
  }
}

</mosaic_0001>

<bundles_post_ra>
// kernel: tpu_custom_call.1
= control target key start
LH: loop header
LB: loop body
LE: loop exit
PB: predicated region body
PF: predicated region fallthrough
CT: control target
= control target key end

     0   :  { %s861_s15 = smov [#allocation3]   ;;  %s1176_s0 = inlined_call_operand.hbm [shape: s32[16], index: 0, kind: input, shape index: {}]   ;;  %s1177_s1 = inlined_call_operand.hbm [shape: f32[8,8,8,8], index: 1, kind: input, shape index: {}]   ;;  %s1178_s2 = inlined_call_operand.hbm [shape: f32[8,16], index: 2, kind: input, shape index: {}]   ;;  %s1179_s3 = inlined_call_operand.hbm [shape: f32[8,16,16,16], index: 3, kind: output, shape index: {}]  }
   0x1   :  { %1182 = sst [smem:[#allocation21_spill]] %s1178_s2  ;;  %s9_s14 = sshll.u32 %s1176_s0, 4  ;;  %s10_s14 = int_to_ptr.hbm [resolvable:$true] %s9_s14 }
   0x2   :  { %12 = dma.hbm_to_smem %s10_s14, 16, %s861_s15, [#allocation2] }
   0x3   :  { %811 = dma.done.wait [#allocation2], 16 }
   0x4   :  { %812 = vsyncadd [#allocation2], 4294967280 }
   0x5   :  { %15 = sfence }
   0x6   :  { %16 = vsyncpa [#allocation5], 0 }
   0x7   :  { %18 = vsyncpa [#allocation5 + $0x1], 0 }
   0x8   :  { %19 = vsyncpa [#allocation8], 0 }
   0x9   :  { %20 = vsyncpa [#allocation6], 0 }
   0xa   :  { %22 = vsyncpa [#allocation6 + $0x1], 0  ;;  %s896_s16 = smov 0   ;;  %s898_s17 = smov 0  }
   0xb   :  { %s900_s18 = smov 0   ;;  %s902_s19 = smov 0  }
   0xc   :  { %s904_s0 = smov 0   ;;  %s906_s20 = smov 0  }
   0xd   :  { %s908_s21 = smov 0   ;;  %s910_s22 = smov 0  }
   0xe   :  { %s912_s23 = smov 0  }
   0xf LB: > { %1183 = sst [smem:[#allocation18_spill]] %s847_s20  ;;  %s557_s24 = sadd.s32 4294967295, %s859_s23   ;;  %s859_s23 = sphi %s912_s23, %s28_s23   ;;  %s855_s22 = sphi %s910_s22, %s1202_s22   ;;  %s851_s21 = sphi %s908_s21, %s1201_s21   ;;  %s847_s20 = sphi %s906_s20, %s1194_s20   ;;  %s843_s0 = sphi %s904_s0, %s1200_s0   ;;  %s839_s19 = sphi %s902_s19, %s1199_s19   ;;  %s835_s18 = sphi %s900_s18, %s1198_s18   ;;  %s831_s17 = sphi %s898_s17, %s1197_s17   ;;  %s827_s16 = sphi %s896_s16, %s1196_s16  }
  0x10   : > { %s558_s25 = sadd.s32 4294967294, %s859_s23   ;;  %s37_s26 = sadd.s32 1, %s855_s22 }
  0x11   : > { %p38_p0 = scmp.ge.s32.totalorder %s37_s26, 16  ;;  %s44_s27 = sld [smem:[#allocation3 + %s855_s22]] }
  0x12   : > { %s51_s28 = sadd.s32 1, %s847_s20  ;;  %p58_p1 = scmp.ne.s32.totalorder %s847_s20, %s843_s0 }
  0x13   : > { %s1204_s26 = smov (%p38_p0, %s37_s26), 0  ;;  %p59_p2 = scmp.eq.s32.totalorder %s859_s23, 0 }
  0x14   : > { %1184 = sst [smem:[#allocation19_spill]] %s1204_s26  ;;  %p64_p3 = scmp.ne.s32.totalorder %s843_s0, %s839_s19 }
  0x15   : > { %s45_s29 = sld [smem:[#allocation3 + %s1204_s26]]  ;;  %p951_p4 = scmp.eq.s32.totalorder %s557_s24, 0 }
  0x16   : > { %s96_s4 = ssub.s32 %s855_s22, %s1204_s26  ;;  %s100_s5 = sadd.s32 1, %s835_s18 }
  0x17   : > { %p960_p5 = por %p951_p4, %p64_p3  ;;  %p98_p6 = scmp.eq.s32.totalorder %s96_s4, 0 }
  0x18   : > { %p110_p7 = scmp.ne.s32.totalorder %s835_s18, %s831_s17  ;;  %p111_p8 = scmp.eq.s32.totalorder %s557_s24, 15 }
  0x19   : > { %s967_s7 = scalar_select %p98_p6, %s835_s18, %s100_s5  }
  0x1a   : > { %p969_p9 = por %p111_p8, %p110_p7  ;;  %p116_p10 = scmp.ne.s32.totalorder %s831_s17, %s827_s16 }
  0x1b   : > { %s47_s9 = ssub.s32 %s44_s27, %s45_s29  ;;  %p117_p11 = scmp.eq.s32.totalorder %s558_s25, 15 }
  0x1c   : > { %p49_p12 = scmp.eq.s32.totalorder %s47_s9, 0  ;;  %p559_p13 = scmp.ge.s32.totalorder %s859_s23, 1 }
  0x1d   : > { %p976_p0 = por %p117_p11, %p116_p10  ;;  %p124_p3 = scmp.lt.s32.totalorder %s859_s23, 17 }
  0x1e   : > { %s982_s11 = scalar_select %p49_p12, %s847_s20, %s51_s28  }
  0x1f   : > { %p984_p6 = pnand %p559_p13, %p124_p3  ;;  %s1191_s2 = sld [smem:[#allocation21_spill]] }
  0x20   : > { %1189 = sst [smem:[#allocation20_spill]] %s982_s11  ;;  %s862_s19 = smov [#allocation7]  }
  0x21   : > { %p601_p7 = pneg %p984_p6  ;;  %s138_s24 = sshll.u32 %s862_s19, 4  ;;  %s139_s24 = int_to_ptr.vmem [resolvable:$true] %s138_s24 }
  0x22   : > { %p60_p10 = por %p59_p2, %p58_p1  ;;  %p616_p11 = scmp.lt.s32.totalorder %s859_s23, 16 }
  0x23   : > { %p602_p8 = pnand %p601_p7, %p951_p4  ;;  %s149_s25 = sand.u32 1, %s847_s20  }
  0x24   : > { %p1002_p12 = pnand %p616_p11, %p60_p10  ;;  %s562_s28 = sshll.u32 %s149_s25, 6 }
  0x25   : > { %s136_s15 = sshll.u32 %s1191_s2, 4  ;;  %s153_s9 = scalar_lea.vmem [#allocation4], %s562_s28  ;;  %s137_s15 = int_to_ptr.hbm [resolvable:$true] %s136_s15 }
  0x26   : > { %604 = dma.hbm_to_vmem [thread:$0]  (!%p602_p8), %s137_s15, 128, %s139_s24, [#allocation8]  }
  0x27   : > { %s587_s29 = scalar_select %p60_p10, [#allocation3], [#allocation12] }
  0x28   : > { %s588_s4 = scalar_select %p60_p10, %s855_s22, 0 }
  0x29   : > { %s1206_s29 = smov (!%p616_p11, %s587_s29), [#allocation13]  ;;  %s164_s13 = sshll.u32 %s153_s9, 4  ;;  %s165_s13 = int_to_ptr.vmem [resolvable:$true] %s164_s13 }
  0x2a   : > { %s1208_s4 = smov (!%p616_p11, %s588_s4), 0  ;;  %s150_s24 = scalar_lea.sflag [#allocation5], %s149_s25 }
  0x2b   : > { %s154_s5 = sld [smem:[%s1206_s29 + %s1208_s4]]  ;;  %p749_p2 = pneg %p1002_p12 }
  0x2c   : > { %s752_s4 = scalar_lea.hbm %s1177_s1, 512 }
  0x31   : > { %s563_s14 = sshll.u32 %s154_s5, 3 }
  0x32   : > { %s161_s26 = scalar_lea.hbm %s1177_s1, %s563_s14 }
  0x33   : > { %s162_s15 = sshll.u32 %s161_s26, 4  ;;  %s163_s15 = int_to_ptr.hbm [resolvable:$true] %s162_s15 }
  0x34   : > { %s745_s11 = sshra.s32 %s163_s15, 4  ;;  %s746_s11 = int_to_ptr.hbm [resolvable:$true] %s745_s11 }
  0x35   : > { %s747_s20 = scalar_lea.hbm %s746_s11, 64  ;;  %p753_p7 = scmp.lt.s32.totalorder %s746_s11, %s1177_s1 }
  0x36   : > { %p748_p1 = scmp.ne.s32.totalorder %s746_s11, %s747_s20  ;;  %p754_p8 = scmp.lt.s32.totalorder %s752_s4, %s747_s20 }
  0x38   : > { %p750_p13 = pnand %p749_p2, %p748_p1  ;;  %p755_p10 = por %p754_p8, %p753_p7 }
  0x3a   : > { %p751_p3 = pneg %p750_p13 }
  0x3c   : > { %p756_p11 = pnand %p755_p10, %p751_p3 }
  0x3e   : > { %759 = shalt.err (!%p756_p11)
}
  0x3f   : > { %s863_s2 = smov 1024   ;;  %s864_s26 = smov 128  }
  0x40   : > { %s865_s25 = smov 8   ;;  %176 = sbr.rel (%p984_p6) target bundleno = 243 (0xf3), region = 28 }
  0x41   : > { %610 = dma.hbm_to_vmem [thread:$0]  (!%p1002_p12), %s163_s15, 1024, %s165_s13, %s150_s24, %s863_s2, %s864_s26, %s865_s25  }
  0x42   : > { %s178_s14 = sand.u32 (!%p984_p6), 1, %s843_s0  }
  0x43   : > { %s565_s19 = sshll.u32 (!%p984_p6), %s178_s14, 6  ;;  %s179_s29 = scalar_lea.sflag (!%p984_p6), [#allocation5], %s178_s14 }
  0x44   : > { %s182_s28 = scalar_lea.vmem (!%p984_p6), [#allocation4], %s565_s19 }
  0x45   : > { %814 = dma.done.wait (%p960_p5), %s179_s29, 1024  }
  0x46   : > { %816 = vsyncadd (%p960_p5), %s179_s29, 4294966272 }
  0x47   : > { %818 = dma.done.wait (%p951_p4), [#allocation8], 128  }
  0x48   : > { %820 = vsyncadd (%p951_p4), [#allocation8], 4294967168  ;;  %vm221_vm0 = vcmask 64512   ;;  %v220_v0 = vld [vmem:[#allocation7] sm:$0xff]  ;;  %v218_v2 = vld [vmem:[%s182_s28 + $0x30] sm:$0xff]  ;;  %s206_s20 = sand.u32 1, %s831_s17  }
  0x49   : > { %v216_v1 = vld [vmem:[%s182_s28 + $0x20] sm:$0xff]  ;;  %583 = vmatpush.msra.mxu2 %v220_v0  ;;  %584 = vmatpush.msra.mxu3 %v220_v0  ;;  %v214_v4 = vld [vmem:[%s182_s28 + $0x10] sm:$0xff]  ;;  %v217_v5 = vld [vmem:[%s182_s28 + $0x28] sm:$0xff]  ;;  %s567_s30 = sshll.u32 %s206_s20, 7  ;;  %vm351_vm1 = vcmask 1041408   ;;  %vm360_vm2 = vcmask 1043456  }
  0x4a   : > { %v212_v3 = vld [vmem:[%s182_s28] sm:$0xff]  ;;  %572 = vmatmul.msk.f32.vlgmr.msra.gmra.mxu2 %vm221_vm0, %v216_v1  ;;  %574 = vmatmul.msk.f32.vlgmr.msra.gmra.mxu3 %vm221_vm0, %v218_v2  ;;  %v219_v6 = vld [vmem:[%s182_s28 + $0x38] sm:$0xff]  ;;  %v213_v7 = vld [vmem:[%s182_s28 + $0x8] sm:$0xff]  ;;  %vm369_vm3 = vcmask 1045504   ;;  %vm402_vm4 = vcmask 130048   ;;  %s1048_s6 = scalar_lea.vmem [#allocation9], %s567_s30 }
  0x4b   : > { %261 = vmatpush.msra.mxu0 %v220_v0  ;;  %582 = vmatpush.msra.mxu1 %v220_v0  ;;  %v215_v8 = vld [vmem:[%s182_s28 + $0x18] sm:$0xff]  ;;  %s420_s11 = scalar_lea.sflag [#allocation6], %s206_s20 }
  0x4c   : > { %568 = vmatmul.msk.f32.vlgmr.msra.gmra.mxu0 %vm221_vm0, %v212_v3  ;;  %570 = vmatmul.msk.f32.vlgmr.msra.gmra.mxu1 %vm221_vm0, %v214_v4 }
  0x52   : > { %573 = vmatmul.msk.f32.gmra.mxu2 %vm221_vm0, %v217_v5  ;;  %575 = vmatmul.msk.f32.gmra.mxu3 %vm221_vm0, %v219_v6 }
  0x54   : > { %569 = vmatmul.msk.f32.gmra.mxu0 %vm221_vm0, %v213_v7  ;;  %571 = vmatmul.msk.f32.gmra.mxu1 %vm221_vm0, %v215_v8 }
  0xc9   : > { %v263_v9 = vpop.f32.mrf.mxu0  ;;  %v269_v10 = vpop.f32.mrf.mxu1 }
  0xca   : > { %v287_v11 = vperm.slane %v263_v9, 0  ;;  %v295_v12 = vperm.slane %v263_v9, 1  ;;  %v303_v13 = vperm.slane %v263_v9, 2  ;;  %v311_v14 = vperm.slane %v263_v9, 3 }
  0xcb   : > { %v319_v15 = vperm.slane %v263_v9, 4  ;;  %v327_v16 = vperm.slane %v263_v9, 5  ;;  %v335_v17 = vperm.slane %v263_v9, 6  ;;  %v343_v18 = vperm.slane %v263_v9, 7 }
  0xcc   : > { %v352_v19 = vsel %vm351_vm1, %v287_v11, %v295_v12  ;;  %v289_v20 = vperm.slane %v269_v10, 0  ;;  %v297_v21 = vperm.slane %v269_v10, 1  ;;  %v305_v22 = vperm.slane %v269_v10, 2 }
  0xcd   : > { %v361_v23 = vsel %vm360_vm2, %v352_v19, %v303_v13  ;;  %v378_v24 = vsel %vm351_vm1, %v319_v15, %v327_v16  ;;  %v313_v25 = vperm.slane %v269_v10, 3  ;;  %v321_v26 = vperm.slane %v269_v10, 4  ;;  %v275_v27 = vpop.f32.mrf.mxu2  ;;  %v281_v40 = vpop.f32.mrf.mxu3 }
  0xce   : > { %v370_v28 = vsel %vm369_vm3, %v361_v23, %v311_v14  ;;  %v386_v29 = vsel %vm360_vm2, %v378_v24, %v335_v17  ;;  %v329_v30 = vperm.slane %v269_v10, 5  ;;  %v337_v31 = vperm.slane %v269_v10, 6 }
  0xcf   : > { %v394_v32 = vsel %vm369_vm3, %v386_v29, %v343_v18  ;;  %403 = vst.msk [vmem:[%s1048_s6] sm:$0xff] %vm402_vm4, %v370_v28  ;;  %v345_v33 = vperm.slane %v269_v10, 7  ;;  %v354_v34 = vsel %vm351_vm1, %v289_v20, %v297_v21  ;;  %v291_v35 = vperm.slane %v275_v27, 0 }
  0xd0   : > { %404 = vst.msk [vmem:[%s1048_s6 + $0x8] sm:$0xff] %vm402_vm4, %v394_v32  ;;  %v363_v36 = vsel %vm360_vm2, %v354_v34, %v305_v22  ;;  %v380_v37 = vsel %vm351_vm1, %v321_v26, %v329_v30  ;;  %v299_v38 = vperm.slane %v275_v27, 1  ;;  %v307_v39 = vperm.slane %v275_v27, 2 }
  0xd1   : > { %v372_v41 = vsel %vm369_vm3, %v363_v36, %v313_v25  ;;  %v388_v42 = vsel %vm360_vm2, %v380_v37, %v337_v31  ;;  %v315_v43 = vperm.slane %v275_v27, 3  ;;  %v323_v44 = vperm.slane %v275_v27, 4  ;;  %v266_v53 = vpop.f32.mrf.mxu0  ;;  %v272_v6 = vpop.f32.mrf.mxu1 }
  0xd2   : > { %v396_v45 = vsel %vm369_vm3, %v388_v42, %v345_v33  ;;  %407 = vst.msk [vmem:[%s1048_s6 + $0x20] sm:$0xff] %vm402_vm4, %v372_v41  ;;  %v331_v46 = vperm.slane %v275_v27, 5  ;;  %v339_v47 = vperm.slane %v275_v27, 6  ;;  %v347_v48 = vperm.slane %v275_v27, 7 }
  0xd3   : > { %408 = vst.msk [vmem:[%s1048_s6 + $0x28] sm:$0xff] %vm402_vm4, %v396_v45  ;;  %v356_v49 = vsel %vm351_vm1, %v291_v35, %v299_v38  ;;  %v293_v50 = vperm.slane %v281_v40, 0  ;;  %v301_v51 = vperm.slane %v281_v40, 1  ;;  %v309_v52 = vperm.slane %v281_v40, 2 }
  0xd4   : > { %v365_v54 = vsel %vm360_vm2, %v356_v49, %v307_v39  ;;  %v382_v55 = vsel %vm351_vm1, %v323_v44, %v331_v46  ;;  %v317_v56 = vperm.slane %v281_v40, 3  ;;  %v325_v57 = vperm.slane %v281_v40, 4 }
  0xd5   : > { %v374_v58 = vsel %vm369_vm3, %v365_v54, %v315_v43  ;;  %v390_v59 = vsel %vm360_vm2, %v382_v55, %v339_v47  ;;  %v333_v60 = vperm.slane %v281_v40, 5  ;;  %v341_v61 = vperm.slane %v281_v40, 6  ;;  %v278_v19 = vpop.f32.mrf.mxu2  ;;  %v284_v36 = vpop.f32.mrf.mxu3 }
  0xd6   : > { %v398_v62 = vsel %vm369_vm3, %v390_v59, %v347_v48  ;;  %411 = vst.msk [vmem:[%s1048_s6 + $0x40] sm:$0xff] %vm402_vm4, %v374_v58  ;;  %v349_v63 = vperm.slane %v281_v40, 7  ;;  %v358_v0 = vsel %vm351_vm1, %v293_v50, %v301_v51  ;;  %v288_v1 = vperm.slane %v266_v53, 0 }
  0xd7   : > { %412 = vst.msk [vmem:[%s1048_s6 + $0x48] sm:$0xff] %vm402_vm4, %v398_v62  ;;  %v367_v2 = vsel %vm360_vm2, %v358_v0, %v309_v52  ;;  %v384_v3 = vsel %vm351_vm1, %v325_v57, %v333_v60  ;;  %v296_v4 = vperm.slane %v266_v53, 1  ;;  %v304_v5 = vperm.slane %v266_v53, 2 }
  0xd8   : > { %v376_v7 = vsel %vm369_vm3, %v367_v2, %v317_v56  ;;  %v392_v8 = vsel %vm360_vm2, %v384_v3, %v341_v61  ;;  %v312_v9 = vperm.slane %v266_v53, 3  ;;  %v320_v10 = vperm.slane %v266_v53, 4 }
  0xd9   : > { %v400_v11 = vsel %vm369_vm3, %v392_v8, %v349_v63  ;;  %415 = vst.msk [vmem:[%s1048_s6 + $0x60] sm:$0xff] %vm402_vm4, %v376_v7  ;;  %v328_v12 = vperm.slane %v266_v53, 5  ;;  %v336_v13 = vperm.slane %v266_v53, 6  ;;  %v344_v14 = vperm.slane %v266_v53, 7 }
  0xda   : > { %416 = vst.msk [vmem:[%s1048_s6 + $0x68] sm:$0xff] %vm402_vm4, %v400_v11  ;;  %v353_v15 = vsel %vm351_vm1, %v288_v1, %v296_v4  ;;  %v290_v16 = vperm.slane %v272_v6, 0  ;;  %v298_v17 = vperm.slane %v272_v6, 1  ;;  %v306_v18 = vperm.slane %v272_v6, 2 }
  0xdb   : > { %v362_v20 = vsel %vm360_vm2, %v353_v15, %v304_v5  ;;  %v379_v21 = vsel %vm351_vm1, %v320_v10, %v328_v12  ;;  %v314_v22 = vperm.slane %v272_v6, 3  ;;  %v322_v23 = vperm.slane %v272_v6, 4 }
  0xdc   : > { %v371_v24 = vsel %vm369_vm3, %v362_v20, %v312_v9  ;;  %v387_v25 = vsel %vm360_vm2, %v379_v21, %v336_v13  ;;  %v330_v26 = vperm.slane %v272_v6, 5  ;;  %v338_v27 = vperm.slane %v272_v6, 6 }
  0xdd   : > { %v395_v28 = vsel %vm369_vm3, %v387_v25, %v344_v14  ;;  %405 = vst.msk [vmem:[%s1048_s6 + $0x10] sm:$0xff] %vm402_vm4, %v371_v24  ;;  %v346_v29 = vperm.slane %v272_v6, 7  ;;  %v355_v30 = vsel %vm351_vm1, %v290_v16, %v298_v17  ;;  %v292_v31 = vperm.slane %v278_v19, 0 }
  0xde   : > { %406 = vst.msk [vmem:[%s1048_s6 + $0x18] sm:$0xff] %vm402_vm4, %v395_v28  ;;  %v364_v32 = vsel %vm360_vm2, %v355_v30, %v306_v18  ;;  %v381_v33 = vsel %vm351_vm1, %v322_v23, %v330_v26  ;;  %v300_v34 = vperm.slane %v278_v19, 1  ;;  %v308_v35 = vperm.slane %v278_v19, 2 }
  0xdf   : > { %v373_v37 = vsel %vm369_vm3, %v364_v32, %v314_v22  ;;  %v389_v38 = vsel %vm360_vm2, %v381_v33, %v338_v27  ;;  %v324_v39 = vperm.slane %v278_v19, 4  ;;  %v316_v41 = vperm.slane %v278_v19, 3 }
  0xe0   : > { %v397_v40 = vsel %vm369_vm3, %v389_v38, %v346_v29  ;;  %409 = vst.msk [vmem:[%s1048_s6 + $0x30] sm:$0xff] %vm402_vm4, %v373_v37  ;;  %v332_v42 = vperm.slane %v278_v19, 5  ;;  %v340_v43 = vperm.slane %v278_v19, 6  ;;  %v357_v44 = vsel %vm351_vm1, %v292_v31, %v300_v34 }
  0xe1   : > { %410 = vst.msk [vmem:[%s1048_s6 + $0x38] sm:$0xff] %vm402_vm4, %v397_v40  ;;  %v294_v45 = vperm.slane %v284_v36, 0  ;;  %v302_v46 = vperm.slane %v284_v36, 1  ;;  %v310_v47 = vperm.slane %v284_v36, 2  ;;  %v348_v48 = vperm.slane %v278_v19, 7 }
  0xe2   : > { %v366_v49 = vsel %vm360_vm2, %v357_v44, %v308_v35  ;;  %v383_v50 = vsel %vm351_vm1, %v324_v39, %v332_v42  ;;  %v326_v51 = vperm.slane %v284_v36, 4  ;;  %v334_v54 = vperm.slane %v284_v36, 5 }
  0xe3   : > { %v375_v52 = vsel %vm369_vm3, %v366_v49, %v316_v41  ;;  %v391_v53 = vsel %vm360_vm2, %v383_v50, %v340_v43  ;;  %v342_v55 = vperm.slane %v284_v36, 6  ;;  %v318_v57 = vperm.slane %v284_v36, 3 }
  0xe4   : > { %v399_v56 = vsel %vm369_vm3, %v391_v53, %v348_v48  ;;  %413 = vst.msk [vmem:[%s1048_s6 + $0x50] sm:$0xff] %vm402_vm4, %v375_v52  ;;  %v359_v58 = vsel %vm351_vm1, %v294_v45, %v302_v46  ;;  %v350_v59 = vperm.slane %v284_v36, 7  ;;  %v385_v61 = vsel %vm351_vm1, %v326_v51, %v334_v54 }
  0xe5   : > { %414 = vst.msk [vmem:[%s1048_s6 + $0x58] sm:$0xff] %vm402_vm4, %v399_v56  ;;  %v368_v60 = vsel %vm360_vm2, %v359_v58, %v310_v47  ;;  %v393_v63 = vsel %vm360_vm2, %v385_v61, %v342_v55 }
  0xe6   : > { %v377_v62 = vsel %vm369_vm3, %v368_v60, %v318_v57  ;;  %v401_v0 = vsel %vm369_vm3, %v393_v63, %v350_v59 }
  0xe7   : > { %417 = vst.msk [vmem:[%s1048_s6 + $0x70] sm:$0xff] %vm402_vm4, %v377_v62 }
  0xe8   : > { %418 = vst.msk [vmem:[%s1048_s6 + $0x78] sm:$0xff] %vm402_vm4, %v401_v0 }
  0xe9   : > { %s581_s12 = sshll.u32 %s851_s21, 4  ;;  %s445_s27 = sshll.u32 %s1048_s6, 4  ;;  %s446_s27 = int_to_ptr.vmem [resolvable:$true] %s445_s27 }
  0xea   : > { %s434_s24 = scalar_lea.hbm %s1179_s3, %s581_s12  ;;  %s866_s5 = smov 256  }
  0xeb   : > { %s447_s4 = sshll.u32 %s434_s24, 4  ;;  %593 = sst [smem:[#allocation11]] (%p969_p9), %s866_s5  ;;  %s448_s4 = int_to_ptr.hbm [resolvable:$true] %s447_s4 }
  0xec   : > { %s867_s9 = smov 4096   ;;  %s868_s2 = smov 2  }
  0xed   : > { %594 = sst [smem:[#allocation11 + $0x1]] (%p969_p9), %s867_s9  ;;  %s869_s21 = smov 128  }
  0xee   : > { %595 = sst [smem:[#allocation11 + $0x2]] (%p969_p9), %s868_s2  ;;  %s870_s26 = smov 8  }
  0xef   : > { %596 = sst [smem:[#allocation11 + $0x3]] (%p969_p9), %s869_s21  ;;  %s871_s25 = smov [#allocation10]  }
  0xf0   : > { %597 = sst [smem:[#allocation11 + $0x4]] (%p969_p9), %s869_s21  ;;  %s872_s14 = smov 0  }
  0xf1   : > { %598 = sst [smem:[#allocation11 + $0x5]] (%p969_p9), %s870_s26 }
  0xf2   : > { %599 = dma.general (%p969_p9), %s446_s27, 2048, %s448_s4, %s420_s11, %s871_s25, [#allocation11], %s872_s14, 0  }
  0xf3 PF: > { %p618_p4 = scmp.ge.s32.totalorder %s859_s23, 2  ;;  %s475_s19 = sand.u32 1, %s827_s16  }
  0xf4   : > { %s476_s29 = scalar_lea.sflag [#allocation6], %s475_s19 }
  0xf5   : > { %p612_p5 = pnand %p618_p4, %p976_p0 }
  0xf7   : > { %p613_p6 = pneg %p612_p5 }
  0xf9   : > { %822 = dma.done.wait (%p613_p6), %s476_s29, 2048  }
  0xfa   : > { %824 = vsyncadd (%p613_p6), %s476_s29, 4294965248  ;;  %s28_s23 = sadd.s32 1, %s859_s23   ;;  %s1193_s8 = sld [smem:[#allocation18_spill]] }
  0xfb   : > { %p25_p12 = scmp.ge.s32.totalorder %s28_s23, 18   ;;  %s1194_s20 = sld [smem:[#allocation20_spill]] }
  0xfc   : > { %s1195_s28 = sld [smem:[#allocation19_spill]]  ;;  %s1196_s16 = smov %s831_s17 }
  0xfd   : > { %s1197_s17 = smov %s835_s18  ;;  %s1198_s18 = smov %s967_s7 }
  0xfe   : > { %s1199_s19 = smov %s843_s0  ;;  %s1201_s21 = smov %s855_s22 }
  0xff   :  { %27 = sbr.rel (!%p25_p12) target bundleno = 15 (0xf), region = 82 }
 0x100   : > { %s1200_s0 = smov %s1193_s8 }
 0x102   : > { %s1202_s22 = smov %s1195_s28 }
 0x104   :  { %482 = vsyncpa [#allocation5], 1 }
 0x105   :  { %484 = vsyncpa [#allocation5 + $0x1], 1 }
 0x106   :  { %485 = vsyncpa [#allocation8], 1 }
 0x107   :  { %486 = vsyncpa [#allocation6], 1 }
 0x108   :  { %488 = vsyncpa [#allocation6 + $0x1], 1 }

</bundles_post_ra>
